<compile_context>
chip_gen: v6e
topology: v6e:2x2x1
jax: 0.10.0
libtpu: 0.0.40
codegen_flags: <defaults>
</compile_context>

<pallas_src>
import functools

import jax
import jax.numpy as jnp
from jax import lax
from jax.experimental import pallas as pl
from jax.experimental.pallas import tpu as pltpu

EPS = 1e-5


def _fused_pool_bn_kernel(x1_ref, x2_ref, g1_ref, b1_ref, g2_ref, b2_ref,
                          o1_ref, o2_ref, *, inv_n):
    # AvgPool2d(2,2): mean of the four window slabs (pure VALU, fully
    # lane/sublane-dense, no XLU work).
    pooled = 0.25 * (x1_ref[0] + x1_ref[1] + x1_ref[2] + x1_ref[3])     # (R, C1)

    # Per-channel batch statistics, centered formulation (numerically safer than
    # E[x^2]-E[x]^2).  The data is VMEM-resident so the second pass is free.
    mean1 = jnp.sum(pooled, axis=0, keepdims=True) * inv_n              # (1, C1)
    d1 = pooled - mean1
    var1 = jnp.sum(d1 * d1, axis=0, keepdims=True) * inv_n
    scale1 = g1_ref[...] * lax.rsqrt(var1 + EPS)                        # EUP
    o1_ref[...] = d1 * scale1 + b1_ref[...]                             # FMA

    x2 = x2_ref[...]                                                    # (R, C2)
    mean2 = jnp.sum(x2, axis=0, keepdims=True) * inv_n
    d2 = x2 - mean2
    var2 = jnp.sum(d2 * d2, axis=0, keepdims=True) * inv_n
    scale2 = g2_ref[...] * lax.rsqrt(var2 + EPS)
    # C2 (48 / 32) < 128 lanes -> masked stores, but the slab is tiny so the
    # g-fold lane-packing trick is deliberately not applied.
    o2_ref[...] = d2 * scale2 + b2_ref[...]


def fused_avgpool_cat_batchnorm(x1_nchw, x2_nchw, gamma, beta):
    N, C1, H, W = x1_nchw.shape
    N2, C2, Hp, Wp = x2_nchw.shape
    assert N == N2 and H == 2 * Hp and W == 2 * Wp
    R = N * Hp * Wp

    # Whole-problem-in-VMEM fused kernel; fail loudly rather than OOM if shapes
    # ever outgrow a conservative VMEM budget.
    vmem_bytes = 4 * (4 * R * C1 + 2 * R * C1 + 2 * R * C2 + 4 * (C1 + C2))
    assert vmem_bytes < 24 * 1024 * 1024, (
        "shapes too large for the single-step fused kernel; add row tiling")
    # TODO(synk): for much larger N*H*W, switch to a (2, num_row_tiles) phase grid
    # with the pooled slab held in a VMEM scratch (and a v7x 'parallel' split);
    # at this module's sizes a single fused step is strictly faster.

    # ---- layout plumbing (one XLA transpose per input): window-major,
    # channels-last (4, R, C1) for the pooled path and (R, C2) for x2. ----
    # TODO(synk): keeping activations NHWC end-to-end upstream would remove these
    # wrapper layout passes entirely.
    x1w = jnp.transpose(
        x1_nchw.reshape(N, C1, Hp, 2, Wp, 2), (3, 5, 0, 2, 4, 1)
    ).reshape(4, R, C1).astype(jnp.float32)
    x2w = jnp.transpose(x2_nchw, (0, 2, 3, 1)).reshape(R, C2).astype(jnp.float32)

    gamma = gamma.astype(jnp.float32)
    beta = beta.astype(jnp.float32)
    g1 = gamma[:C1].reshape(1, C1)
    b1 = beta[:C1].reshape(1, C1)
    g2 = gamma[C1:].reshape(1, C2)
    b2 = beta[C1:].reshape(1, C2)

    kernel = functools.partial(_fused_pool_bn_kernel, inv_n=float(1.0 / R))

    out1, out2 = pl.pallas_call(
        kernel,
        out_shape=(
            jax.ShapeDtypeStruct((R, C1), jnp.float32),
            jax.ShapeDtypeStruct((R, C2), jnp.float32),
        ),
        grid=(1,),
        # All blocks are full-extent -> no (8,128) divisibility requirement,
        # no row padding, no in-kernel tail masking needed.
        in_specs=[
            pl.BlockSpec((4, R, C1), lambda i: (0, 0, 0)),
            pl.BlockSpec((R, C2), lambda i: (0, 0)),
            pl.BlockSpec((1, C1), lambda i: (0, 0)),
            pl.BlockSpec((1, C1), lambda i: (0, 0)),
            pl.BlockSpec((1, C2), lambda i: (0, 0)),
            pl.BlockSpec((1, C2), lambda i: (0, 0)),
        ],
        out_specs=(
            pl.BlockSpec((R, C1), lambda i: (0, 0)),
            pl.BlockSpec((R, C2), lambda i: (0, 0)),
        ),
        compiler_params=pltpu.CompilerParams(
            dimension_semantics=("arbitrary",)),
    )(x1w, x2w, g1, b1, g2, b2)

    # ---- reassembly: ONE channel concat (still channels-last) + ONE transpose
    # back to NCHW to match the PyTorch module's output layout. ----
    y = jnp.concatenate(
        [out1.reshape(N, Hp, Wp, C1), out2.reshape(N, Hp, Wp, C2)], axis=-1)
    # TODO(synk): BatchNorm2d running_mean/running_var buffer updates are not
    # materialized (only the training-mode forward output is reproduced).
    return jnp.transpose(y, (0, 3, 1, 2))


def reference(x1, x2, gamma, beta):
    """Pure-JAX reference of the PyTorch forward (training-mode BatchNorm)."""
    N, C1, H, W = x1.shape
    Hp, Wp = H // 2, W // 2
    pooled = x1.reshape(N, C1, Hp, 2, Wp, 2).mean(axis=(3, 5))
    y = jnp.concatenate([pooled, x2], axis=1)
    mean = y.mean(axis=(0, 2, 3), keepdims=True)
    var = ((y - mean) ** 2).mean(axis=(0, 2, 3), keepdims=True)
    return (y - mean) / jnp.sqrt(var + EPS) * gamma.reshape(1, -1, 1, 1) + beta.reshape(
        1, -1, 1, 1
    )


if __name__ == "__main__":
    key = jax.random.PRNGKey(0)
    k1, k2, k3, k4 = jax.random.split(key, 4)

    # Small shapes consistent with the module (orig: C1=1056, C2=48, H=W=14).
    N, C1, C2, H, W = 2, 96, 32, 14, 14
    Ctot = C1 + C2

    x396 = jax.random.normal(k1, (N, C1, H, W), jnp.float32)
    x404 = jax.random.normal(k2, (N, C2, H // 2, W // 2), jnp.float32)

    # Deterministic BatchNorm affine parameters (shape (Ctot,) as in __init__).
    gamma = 1.0 + 0.1 * jax.random.normal(k3, (Ctot,), jnp.float32)
    beta = 0.1 * jax.random.normal(k4, (Ctot,), jnp.float32)

    out = fused_avgpool_cat_batchnorm(x396, x404, gamma, beta)
    out = jax.block_until_ready(out)

    ref = reference(x396, x404, gamma, beta)
    assert out.shape == (N, Ctot, H // 2, W // 2), out.shape
    assert jnp.allclose(out, ref, atol=1e-4, rtol=1e-4), float(
        jnp.max(jnp.abs(out - ref))
    )
    print("KERNEL_OK")
</pallas_src>

<mosaic_0001>
module attributes {stable_mosaic.version = 11 : i64} {
  func.func @_fused_pool_bn_kernel(%arg0: i32, %arg1: memref<4x98x96xf32, #tpu.memory_space<vmem>>, %arg2: memref<98x32xf32, #tpu.memory_space<vmem>>, %arg3: memref<1x96xf32, #tpu.memory_space<vmem>>, %arg4: memref<1x96xf32, #tpu.memory_space<vmem>>, %arg5: memref<1x32xf32, #tpu.memory_space<vmem>>, %arg6: memref<1x32xf32, #tpu.memory_space<vmem>>, %arg7: memref<98x96xf32, #tpu.memory_space<vmem>>, %arg8: memref<98x32xf32, #tpu.memory_space<vmem>>) attributes {dimension_semantics = [#tpu.dimension_semantics<arbitrary>], iteration_bounds = array<i64: 1>, scalar_prefetch = 0 : i64, scratch_operands = 0 : i64, tpu.core_type = #tpu.core_type<tc>, window_params = [{pipeline_mode = #tpu.pipeline_mode<synchronous>, transform_indices = @transform_0, window_bounds = array<i64: 4, 98, 96>}, {pipeline_mode = #tpu.pipeline_mode<synchronous>, transform_indices = @transform_1, window_bounds = array<i64: 98, 32>}, {pipeline_mode = #tpu.pipeline_mode<synchronous>, transform_indices = @transform_2, window_bounds = array<i64: 1, 96>}, {pipeline_mode = #tpu.pipeline_mode<synchronous>, transform_indices = @transform_3, window_bounds = array<i64: 1, 96>}, {pipeline_mode = #tpu.pipeline_mode<synchronous>, transform_indices = @transform_4, window_bounds = array<i64: 1, 32>}, {pipeline_mode = #tpu.pipeline_mode<synchronous>, transform_indices = @transform_5, window_bounds = array<i64: 1, 32>}, {pipeline_mode = #tpu.pipeline_mode<synchronous>, transform_indices = @transform_6, window_bounds = array<i64: 98, 96>}, {pipeline_mode = #tpu.pipeline_mode<synchronous>, transform_indices = @transform_7, window_bounds = array<i64: 98, 32>}]} {
    %c0 = arith.constant 0 : index
    %c0_0 = arith.constant 0 : index
    %c0_1 = arith.constant 0 : index
    %0 = vector.load %arg1[%c0, %c0_0, %c0_1] : memref<4x98x96xf32, #tpu.memory_space<vmem>>, vector<1x98x96xf32>
    %1 = vector.shape_cast %0 : vector<1x98x96xf32> to vector<98x96xf32>
    %c1 = arith.constant 1 : index
    %c0_2 = arith.constant 0 : index
    %c0_3 = arith.constant 0 : index
    %2 = vector.load %arg1[%c1, %c0_2, %c0_3] : memref<4x98x96xf32, #tpu.memory_space<vmem>>, vector<1x98x96xf32>
    %3 = vector.shape_cast %2 : vector<1x98x96xf32> to vector<98x96xf32>
    %4 = arith.addf %1, %3 : vector<98x96xf32>
    %c2 = arith.constant 2 : index
    %c0_4 = arith.constant 0 : index
    %c0_5 = arith.constant 0 : index
    %5 = vector.load %arg1[%c2, %c0_4, %c0_5] : memref<4x98x96xf32, #tpu.memory_space<vmem>>, vector<1x98x96xf32>
    %6 = vector.shape_cast %5 : vector<1x98x96xf32> to vector<98x96xf32>
    %7 = arith.addf %4, %6 : vector<98x96xf32>
    %c3 = arith.constant 3 : index
    %c0_6 = arith.constant 0 : index
    %c0_7 = arith.constant 0 : index
    %8 = vector.load %arg1[%c3, %c0_6, %c0_7] : memref<4x98x96xf32, #tpu.memory_space<vmem>>, vector<1x98x96xf32>
    %9 = vector.shape_cast %8 : vector<1x98x96xf32> to vector<98x96xf32>
    %10 = arith.addf %7, %9 : vector<98x96xf32>
    %cst = arith.constant 2.500000e-01 : f32
    %11 = vector.broadcast %cst : f32 to vector<98x96xf32>
    %12 = arith.mulf %11, %10 : vector<98x96xf32>
    %cst_8 = arith.constant dense<0.000000e+00> : vector<96xf32>
    %13 = vector.multi_reduction <add>, %12, %cst_8 [0] : vector<98x96xf32> to vector<96xf32>
    %14 = vector.shape_cast %13 : vector<96xf32> to vector<1x96xf32>
    %cst_9 = arith.constant 0.0102040814 : f32
    %15 = vector.broadcast %cst_9 : f32 to vector<1x96xf32>
    %16 = arith.mulf %14, %15 : vector<1x96xf32>
    %17 = vector.broadcast %16 : vector<1x96xf32> to vector<98x96xf32>
    %18 = arith.subf %12, %17 : vector<98x96xf32>
    %19 = arith.mulf %18, %18 : vector<98x96xf32>
    %cst_10 = arith.constant dense<0.000000e+00> : vector<96xf32>
    %20 = vector.multi_reduction <add>, %19, %cst_10 [0] : vector<98x96xf32> to vector<96xf32>
    %21 = vector.shape_cast %20 : vector<96xf32> to vector<1x96xf32>
    %cst_11 = arith.constant 0.0102040814 : f32
    %22 = vector.broadcast %cst_11 : f32 to vector<1x96xf32>
    %23 = arith.mulf %21, %22 : vector<1x96xf32>
    %c0_12 = arith.constant 0 : index
    %c0_13 = arith.constant 0 : index
    %24 = vector.load %arg3[%c0_12, %c0_13] : memref<1x96xf32, #tpu.memory_space<vmem>>, vector<1x96xf32>
    %cst_14 = arith.constant 9.99999974E-6 : f32
    %25 = vector.broadcast %cst_14 : f32 to vector<1x96xf32>
    %26 = arith.addf %23, %25 : vector<1x96xf32>
    %27 = math.rsqrt %26 : vector<1x96xf32>
    %28 = arith.mulf %24, %27 : vector<1x96xf32>
    %29 = vector.broadcast %28 : vector<1x96xf32> to vector<98x96xf32>
    %30 = arith.mulf %18, %29 : vector<98x96xf32>
    %c0_15 = arith.constant 0 : index
    %c0_16 = arith.constant 0 : index
    %31 = vector.load %arg4[%c0_15, %c0_16] : memref<1x96xf32, #tpu.memory_space<vmem>>, vector<1x96xf32>
    %32 = vector.broadcast %31 : vector<1x96xf32> to vector<98x96xf32>
    %33 = arith.addf %30, %32 : vector<98x96xf32>
    %c0_17 = arith.constant 0 : index
    %c0_18 = arith.constant 0 : index
    %34 = vector.load %arg7[%c0_17, %c0_18] : memref<98x96xf32, #tpu.memory_space<vmem>>, vector<98x96xf32>
    tpu.vector_store %arg7[%c0_17, %c0_18], %33 {strides = array<i32>} : memref<98x96xf32, #tpu.memory_space<vmem>>, vector<98x96xf32>,
    %c0_19 = arith.constant 0 : index
    %c0_20 = arith.constant 0 : index
    %35 = vector.load %arg2[%c0_19, %c0_20] : memref<98x32xf32, #tpu.memory_space<vmem>>, vector<98x32xf32>
    %cst_21 = arith.constant dense<0.000000e+00> : vector<32xf32>
    %36 = vector.multi_reduction <add>, %35, %cst_21 [0] : vector<98x32xf32> to vector<32xf32>
    %37 = vector.shape_cast %36 : vector<32xf32> to vector<1x32xf32>
    %cst_22 = arith.constant 0.0102040814 : f32
    %38 = vector.broadcast %cst_22 : f32 to vector<1x32xf32>
    %39 = arith.mulf %37, %38 : vector<1x32xf32>
    %40 = vector.broadcast %39 : vector<1x32xf32> to vector<98x32xf32>
    %41 = arith.subf %35, %40 : vector<98x32xf32>
    %42 = arith.mulf %41, %41 : vector<98x32xf32>
    %cst_23 = arith.constant dense<0.000000e+00> : vector<32xf32>
    %43 = vector.multi_reduction <add>, %42, %cst_23 [0] : vector<98x32xf32> to vector<32xf32>
    %44 = vector.shape_cast %43 : vector<32xf32> to vector<1x32xf32>
    %cst_24 = arith.constant 0.0102040814 : f32
    %45 = vector.broadcast %cst_24 : f32 to vector<1x32xf32>
    %46 = arith.mulf %44, %45 : vector<1x32xf32>
    %c0_25 = arith.constant 0 : index
    %c0_26 = arith.constant 0 : index
    %47 = vector.load %arg5[%c0_25, %c0_26] : memref<1x32xf32, #tpu.memory_space<vmem>>, vector<1x32xf32>
    %cst_27 = arith.constant 9.99999974E-6 : f32
    %48 = vector.broadcast %cst_27 : f32 to vector<1x32xf32>
    %49 = arith.addf %46, %48 : vector<1x32xf32>
    %50 = math.rsqrt %49 : vector<1x32xf32>
    %51 = arith.mulf %47, %50 : vector<1x32xf32>
    %52 = vector.broadcast %51 : vector<1x32xf32> to vector<98x32xf32>
    %53 = arith.mulf %41, %52 : vector<98x32xf32>
    %c0_28 = arith.constant 0 : index
    %c0_29 = arith.constant 0 : index
    %54 = vector.load %arg6[%c0_28, %c0_29] : memref<1x32xf32, #tpu.memory_space<vmem>>, vector<1x32xf32>
    %55 = vector.broadcast %54 : vector<1x32xf32> to vector<98x32xf32>
    %56 = arith.addf %53, %55 : vector<98x32xf32>
    %c0_30 = arith.constant 0 : index
    %c0_31 = arith.constant 0 : index
    %57 = vector.load %arg8[%c0_30, %c0_31] : memref<98x32xf32, #tpu.memory_space<vmem>>, vector<98x32xf32>
    tpu.vector_store %arg8[%c0_30, %c0_31], %56 {strides = array<i32>} : memref<98x32xf32, #tpu.memory_space<vmem>>, vector<98x32xf32>,
    return
  }
  func.func @transform_0(%arg0: i32) -> (i32, i32, i32) {
    %c0_i32 = arith.constant 0 : i32
    %c0_i32_0 = arith.constant 0 : i32
    %c0_i32_1 = arith.constant 0 : i32
    %c0_i32_2 = arith.constant 0 : i32
    return %c0_i32, %c0_i32_0, %c0_i32_1 : i32, i32, i32
  }
  func.func @transform_1(%arg0: i32) -> (i32, i32) {
    %c0_i32 = arith.constant 0 : i32
    %c0_i32_0 = arith.constant 0 : i32
    %c0_i32_1 = arith.constant 0 : i32
    return %c0_i32, %c0_i32_0 : i32, i32
  }
  func.func @transform_2(%arg0: i32) -> (i32, i32) {
    %c0_i32 = arith.constant 0 : i32
    %c0_i32_0 = arith.constant 0 : i32
    %c0_i32_1 = arith.constant 0 : i32
    return %c0_i32, %c0_i32_0 : i32, i32
  }
  func.func @transform_3(%arg0: i32) -> (i32, i32) {
    %c0_i32 = arith.constant 0 : i32
    %c0_i32_0 = arith.constant 0 : i32
    %c0_i32_1 = arith.constant 0 : i32
    return %c0_i32, %c0_i32_0 : i32, i32
  }
  func.func @transform_4(%arg0: i32) -> (i32, i32) {
    %c0_i32 = arith.constant 0 : i32
    %c0_i32_0 = arith.constant 0 : i32
    %c0_i32_1 = arith.constant 0 : i32
    return %c0_i32, %c0_i32_0 : i32, i32
  }
  func.func @transform_5(%arg0: i32) -> (i32, i32) {
    %c0_i32 = arith.constant 0 : i32
    %c0_i32_0 = arith.constant 0 : i32
    %c0_i32_1 = arith.constant 0 : i32
    return %c0_i32, %c0_i32_0 : i32, i32
  }
  func.func @transform_6(%arg0: i32) -> (i32, i32) {
    %c0_i32 = arith.constant 0 : i32
    %c0_i32_0 = arith.constant 0 : i32
    %c0_i32_1 = arith.constant 0 : i32
    return %c0_i32, %c0_i32_0 : i32, i32
  }
  func.func @transform_7(%arg0: i32) -> (i32, i32) {
    %c0_i32 = arith.constant 0 : i32
    %c0_i32_0 = arith.constant 0 : i32
    %c0_i32_1 = arith.constant 0 : i32
    return %c0_i32, %c0_i32_0 : i32, i32
  }
}

</mosaic_0001>

<bundles_post_ra>
// kernel: tpu_custom_call.1
= control target key start
LH: loop header
LB: loop body
LE: loop exit
PB: predicated region body
PF: predicated region fallthrough
CT: control target
= control target key end

     0   :  { %vm132_vm0 = vcmask 785408   ;;  %vm293_vm1 = vcmask 261120   ;;  %vm156_vm2 = vcmask 779264   ;;  %vm317_vm3 = vcmask 254976   ;;  %s1146_s0 = inlined_call_operand.vmem [shape: f32[4,98,96], index: 0, kind: input, shape index: {}]   ;;  %s1147_s1 = inlined_call_operand.vmem [shape: f32[98,32], index: 1, kind: input, shape index: {}]   ;;  %s1148_s2 = inlined_call_operand.vmem [shape: f32[1,96], index: 2, kind: input, shape index: {}]   ;;  %s1149_s3 = inlined_call_operand.vmem [shape: f32[1,96], index: 3, kind: input, shape index: {}]   ;;  %s1150_s6 = inlined_call_operand.vmem [shape: f32[98,96], index: 6, kind: output, shape index: {0}]   ;;  %s1151_s4 = inlined_call_operand.vmem [shape: f32[1,32], index: 4, kind: input, shape index: {}]   ;;  %s1152_s5 = inlined_call_operand.vmem [shape: f32[1,32], index: 5, kind: input, shape index: {}]   ;;  %s1153_s7 = inlined_call_operand.vmem [shape: f32[98,32], index: 7, kind: output, shape index: {1}]  }
   0x1   :  { %v25_v0 = vld [vmem:[%s1146_s0] sm:$0xff]  ;;  %v26_v1 = vld [vmem:[%s1146_s0 + $0x8] sm:$0xff]  ;;  %v27_v2 = vld [vmem:[%s1146_s0 + $0x10] sm:$0xff] }
   0x2   :  { %v28_v3 = vld [vmem:[%s1146_s0 + $0x18] sm:$0xff]  ;;  %v449_v4 = vld [vmem:[%s1146_s0 + $0x68] sm:$0xff]  ;;  %v450_v5 = vld [vmem:[%s1146_s0 + $0x70] sm:$0xff] }
   0x3   :  { %v451_v6 = vld [vmem:[%s1146_s0 + $0x78] sm:$0xff]  ;;  %v452_v7 = vld [vmem:[%s1146_s0 + $0x80] sm:$0xff]  ;;  %v453_v9 = vld [vmem:[%s1146_s0 + $0x88] sm:$0xff]  ;;  %v52_v10 = vadd.f32 %v449_v4, %v25_v0  ;;  %v53_v11 = vadd.f32 %v450_v5, %v26_v1 }
   0x4   :  { %v29_v8 = vld [vmem:[%s1146_s0 + $0x20] sm:$0xff]  ;;  %v54_v12 = vadd.f32 %v451_v6, %v27_v2  ;;  %v30_v13 = vld [vmem:[%s1146_s0 + $0x28] sm:$0xff]  ;;  %v31_v14 = vld [vmem:[%s1146_s0 + $0x30] sm:$0xff]  ;;  %v55_v15 = vadd.f32 %v452_v7, %v28_v3 }
   0x5   :  { %v454_v16 = vld [vmem:[%s1146_s0 + $0x90] sm:$0xff]  ;;  %v455_v17 = vld [vmem:[%s1146_s0 + $0x98] sm:$0xff]  ;;  %v56_v19 = vadd.f32 %v453_v9, %v29_v8  ;;  %v464_v21 = vld [vmem:[%s1146_s0 + $0xe0] sm:$0xff] }
   0x6   :  { %v462_v18 = vld [vmem:[%s1146_s0 + $0xd0] sm:$0xff]  ;;  %v463_v20 = vld [vmem:[%s1146_s0 + $0xd8] sm:$0xff]  ;;  %v465_v22 = vld [vmem:[%s1146_s0 + $0xe8] sm:$0xff]  ;;  %v81_v26 = vadd.f32 %v464_v21, %v54_v12  ;;  %v57_v30 = vadd.f32 %v454_v16, %v30_v13  ;;  %v58_v33 = vadd.f32 %v455_v17, %v31_v14 }
   0x7   :  { %v466_v23 = vld [vmem:[%s1146_s0 + $0xf0] sm:$0xff]  ;;  %v79_v24 = vadd.f32 %v462_v18, %v52_v10  ;;  %v80_v25 = vadd.f32 %v463_v20, %v53_v11  ;;  %v32_v27 = vld [vmem:[%s1146_s0 + $0x38] sm:$0xff]  ;;  %v33_v28 = vld [vmem:[%s1146_s0 + $0x40] sm:$0xff]  ;;  %v82_v31 = vadd.f32 %v465_v22, %v55_v15 }
   0x8   :  { %v456_v29 = vld [vmem:[%s1146_s0 + $0xa0] sm:$0xff]  ;;  %v457_v32 = vld [vmem:[%s1146_s0 + $0xa8] sm:$0xff]  ;;  %v467_v34 = vld [vmem:[%s1146_s0 + $0xf8] sm:$0xff]  ;;  %v83_v36 = vadd.f32 %v466_v23, %v56_v19 }
   0x9   :  { %v468_v35 = vld [vmem:[%s1146_s0 + $0x100] sm:$0xff]  ;;  %v475_v37 = vld [vmem:[%s1146_s0 + $0x138] sm:$0xff]  ;;  %v477_v39 = vld [vmem:[%s1146_s0 + $0x148] sm:$0xff]  ;;  %v59_v47 = vadd.f32 %v456_v29, %v32_v27  ;;  %v84_v48 = vadd.f32 %v467_v34, %v57_v30  ;;  %v60_v51 = vadd.f32 %v457_v32, %v33_v28 }
   0xa   :  { %v476_v38 = vld [vmem:[%s1146_s0 + $0x140] sm:$0xff]  ;;  %v478_v40 = vld [vmem:[%s1146_s0 + $0x150] sm:$0xff]  ;;  %v479_v41 = vld [vmem:[%s1146_s0 + $0x158] sm:$0xff]  ;;  %v106_v42 = vadd.f32 %v475_v37, %v79_v24  ;;  %v108_v44 = vadd.f32 %v477_v39, %v81_v26  ;;  %v85_v53 = vadd.f32 %v468_v35, %v58_v33 }
   0xb   :  { %v107_v43 = vadd.f32 %v476_v38, %v80_v25  ;;  %v34_v45 = vld [vmem:[%s1146_s0 + $0x48] sm:$0xff]  ;;  %v35_v46 = vld [vmem:[%s1146_s0 + $0x50] sm:$0xff]  ;;  %v109_v49 = vadd.f32 %v478_v40, %v82_v31  ;;  %v480_v54 = vld [vmem:[%s1146_s0 + $0x160] sm:$0xff]  ;;  %v110_v58 = vadd.f32 %v479_v41, %v83_v36 }
   0xc   :  { %v458_v50 = vld [vmem:[%s1146_s0 + $0xb0] sm:$0xff]  ;;  %v469_v52 = vld [vmem:[%s1146_s0 + $0x108] sm:$0xff]  ;;  %v459_v55 = vld [vmem:[%s1146_s0 + $0xb8] sm:$0xff]  ;;  %v648_v59 = vmul.f32 0.25, %v106_v42  ;;  %v655_v62 = vmul.f32 0.25, %v108_v44  ;;  %v111_v4 = vadd.f32 %v480_v54, %v84_v48 }
   0xd   :  { %v470_v56 = vld [vmem:[%s1146_s0 + $0x110] sm:$0xff]  ;;  %v481_v57 = vld [vmem:[%s1146_s0 + $0x168] sm:$0xff]  ;;  %v650_v60 = vmul.f32 0.25, %v107_v43  ;;  %v36_v61 = vld [vmem:[%s1146_s0 + $0x58] sm:$0xff]  ;;  %v61_v2 = vadd.f32 %v458_v50, %v34_v45  ;;  %v86_v3 = vadd.f32 %v469_v52, %v59_v47  ;;  %v666_v5 = vmul.f32 0.25, %v109_v49 }
   0xe   :  { %v37_v63 = vld [vmem:[%s1146_s0 + $0x60] sm:$0x3]  ;;  %v461_v1 = vld [vmem:[%s1146_s0 + $0xc8] sm:$0x3]  ;;  %v62_v6 = vadd.f32 %v459_v55, %v35_v46  ;;  %v471_v7 = vld [vmem:[%s1146_s0 + $0x118] sm:$0xff]  ;;  %v87_v9 = vadd.f32 %v470_v56, %v60_v51  ;;  %v112_v11 = vadd.f32 %v481_v57, %v85_v53  ;;  %v680_v13 = vmul.f32 0.25, %v110_v58 }
   0xf   :  { %v460_v0 = vld [vmem:[%s1146_s0 + $0xc0] sm:$0xff]  ;;  %v482_v10 = vld [vmem:[%s1146_s0 + $0x170] sm:$0xff]  ;;  %v483_v12 = vld [vmem:[%s1146_s0 + $0x178] sm:$0xff]  ;;  %v133_v14 = vsel %vm132_vm0, %v648_v59, 0.0  ;;  %v134_v15 = vsel %vm132_vm0, %v650_v60, 0.0  ;;  %v136_v16 = vsel %vm132_vm0, %v655_v62, 0.0  ;;  %v64_v19 = vadd.f32 %v461_v1, %v37_v63 }
  0x10   :  { %v472_v8 = vld [vmem:[%s1146_s0 + $0x120] sm:$0xff]  ;;  %v63_v18 = vadd.f32 %v460_v0, %v36_v61  ;;  %v135_v20 = vadd.f32 %v134_v15, %v133_v14  ;;  %v696_v21 = vld [vmem:[%s1147_s1 + $0x8] sm:$0xff]  ;;  %v701_v22 = vld [vmem:[%s1147_s1 + $0x10] sm:$0xff]  ;;  %v88_v24 = vadd.f32 %v471_v7, %v61_v2  ;;  %v113_v25 = vadd.f32 %v482_v10, %v86_v3 }
  0x11   :  { %v691_v17 = vld [vmem:[%s1147_s1] sm:$0xff]  ;;  %v473_v23 = vld [vmem:[%s1146_s0 + $0x128] sm:$0xff]  ;;  %v706_v26 = vmul.f32 0.25, %v111_v4  ;;  %v138_v27 = vsel %vm132_vm0, %v666_v5, 0.0  ;;  %v89_v28 = vadd.f32 %v472_v8, %v62_v6  ;;  %v114_v30 = vadd.f32 %v483_v12, %v87_v9  ;;  %v716_v32 = vld [vmem:[%s1147_s1 + $0x18] sm:$0xff] }
  0x12   :  { %v484_v29 = vld [vmem:[%s1146_s0 + $0x180] sm:$0xff]  ;;  %v137_v31 = vadd.f32 %v136_v16, %v135_v20  ;;  %v294_v33 = vsel %vm293_vm1, %v691_v17, 0.0  ;;  %v474_v34 = vld [vmem:[%s1146_s0 + $0x130] sm:$0x3]  ;;  %v723_v35 = vmul.f32 0.25, %v112_v11  ;;  %v140_v36 = vsel %vm132_vm0, %v680_v13, 0.0 }
  0x13   :  { %v295_v37 = vsel %vm293_vm1, %v696_v21, 0.0  ;;  %v297_v38 = vsel %vm293_vm1, %v701_v22, 0.0  ;;  %v90_v39 = vadd.f32 %v473_v23, %v63_v18  ;;  %v485_v40 = vld [vmem:[%s1146_s0 + $0x188] sm:$0xff]  ;;  %v737_v42 = vld [vmem:[%s1147_s1 + $0x20] sm:$0xff]  ;;  %v115_v44 = vadd.f32 %v484_v29, %v88_v24  ;;  %v486_v49 = vld [vmem:[%s1146_s0 + $0x190] sm:$0xff] }
  0x14   :  { %v139_v41 = vadd.f32 %v138_v27, %v137_v31  ;;  %v296_v43 = vadd.f32 %v295_v37, %v294_v33  ;;  %v739_v45 = vmul.f32 0.25, %v113_v25  ;;  %v142_v46 = vsel %vm132_vm0, %v706_v26, 0.0  ;;  %v751_v51 = vld [vmem:[%s1147_s1 + $0x28] sm:$0xff]  ;;  %v487_v57 = vld [vmem:[%s1146_s0 + $0x198] sm:$0x3]  ;;  %v765_v61 = vld [vmem:[%s1147_s1 + $0x30] sm:$0xff] }
  0x15   :  { %v299_v47 = vsel %vm293_vm1, %v716_v32, 0.0  ;;  %v91_v48 = vadd.f32 %v474_v34, %v64_v19  ;;  %v116_v53 = vadd.f32 %v485_v40, %v89_v28  ;;  %v753_v54 = vmul.f32 0.25, %v114_v30  ;;  %v776_v6 = vld [vmem:[%s1147_s1 + $0x38] sm:$0xff]  ;;  %v787_v14 = vld [vmem:[%s1147_s1 + $0x40] sm:$0xff]  ;;  %v798_v23 = vld [vmem:[%s1147_s1 + $0x48] sm:$0xff] }
  0x16   :  { %v141_v50 = vadd.f32 %v140_v36, %v139_v41  ;;  %v298_v52 = vadd.f32 %v297_v38, %v296_v43  ;;  %v144_v55 = vsel %vm132_vm0, %v723_v35, 0.0  ;;  %v301_v56 = vsel %vm293_vm1, %v737_v42, 0.0  ;;  %v809_v30 = vld [vmem:[%s1147_s1 + $0x50] sm:$0xff]  ;;  %v818_v37 = vld [vmem:[%s1147_s1 + $0x58] sm:$0xff]  ;;  %v827_v43 = vld [vmem:[%s1147_s1 + $0x60] sm:$0x3] }
  0x17   :  { %v117_v0 = vadd.f32 %v486_v49, %v90_v39  ;;  %v767_v1 = vmul.f32 0.25, %v115_v44  ;;  %v146_v2 = vsel %vm132_vm0, %v739_v45, 0.0  ;;  %v303_v3 = vsel %vm293_vm1, %v751_v51, 0.0 }
  0x18   :  { %v143_v58 = vadd.f32 %v142_v46, %v141_v50  ;;  %v300_v63 = vadd.f32 %v299_v47, %v298_v52  ;;  %v118_v8 = vadd.f32 %v487_v57, %v91_v48  ;;  %v778_v9 = vmul.f32 0.25, %v116_v53 }
  0x19   :  { %v148_v10 = vsel %vm132_vm0, %v753_v54, 0.0  ;;  %v305_v11 = vsel %vm293_vm1, %v765_v61, 0.0  ;;  %v789_v16 = vmul.f32 0.25, %v117_v0  ;;  %v150_v18 = vsel %vm132_vm0, %v767_v1, 0.0 }
  0x1a   :  { %v145_v4 = vadd.f32 %v144_v55, %v143_v58  ;;  %v302_v7 = vadd.f32 %v301_v56, %v300_v63  ;;  %v307_v19 = vsel %vm293_vm1, %v776_v6, 0.0  ;;  %v800_v25 = vmul.f32 0.25, %v118_v8 }
  0x1b   :  { %v152_v27 = vsel %vm132_vm0, %v778_v9, 0.0  ;;  %v309_v28 = vsel %vm293_vm1, %v787_v14, 0.0  ;;  %v154_v33 = vsel %vm132_vm0, %v789_v16, 0.0  ;;  %v311_v34 = vsel %vm293_vm1, %v798_v23, 0.0 }
  0x1c   :  { %v147_v12 = vadd.f32 %v146_v2, %v145_v4  ;;  %v304_v15 = vadd.f32 %v303_v3, %v302_v7  ;;  %v157_v39 = vsel %vm156_vm2, %v800_v25, 0.0  ;;  %v313_v40 = vsel %vm293_vm1, %v809_v30, 0.0 }
  0x1d   :  { %v315_v46 = vsel %vm293_vm1, %v818_v37, 0.0  ;;  %v318_v49 = vsel %vm317_vm3, %v827_v43, 0.0 }
  0x1e   :  { %v149_v20 = vadd.f32 %v148_v10, %v147_v12  ;;  %v306_v24 = vadd.f32 %v305_v11, %v304_v15 }
  0x20   :  { %v151_v29 = vadd.f32 %v150_v18, %v149_v20  ;;  %v308_v31 = vadd.f32 %v307_v19, %v306_v24 }
  0x22   :  { %v153_v36 = vadd.f32 %v152_v27, %v151_v29  ;;  %v310_v38 = vadd.f32 %v309_v28, %v308_v31 }
  0x24   :  { %v155_v41 = vadd.f32 %v154_v33, %v153_v36  ;;  %v312_v44 = vadd.f32 %v311_v34, %v310_v38 }
  0x26   :  { %v158_v47 = vadd.f32 %v157_v39, %v155_v41  ;;  %v314_v48 = vadd.f32 %v313_v40, %v312_v44 }
  0x28   :  { %v159_v50 = vrot.slane %v158_v47, 4  ;;  %v316_v52 = vadd.f32 %v315_v46, %v314_v48 }
  0x2a   :  { %v160_v53 = vadd.f32 %v159_v50, %v158_v47  ;;  %v319_v55 = vadd.f32 %v318_v49, %v316_v52 }
  0x2c   :  { %v161_v56 = vrot.slane %v160_v53, 2  ;;  %v320_v57 = vrot.slane %v319_v55, 4 }
  0x2e   :  { %v162_v58 = vadd.f32 %v161_v56, %v160_v53  ;;  %v321_v63 = vadd.f32 %v320_v57, %v319_v55 }
  0x30   :  { %v163_v0 = vrot.slane %v162_v58, 1  ;;  %v322_v3 = vrot.slane %v321_v63, 2 }
  0x32   :  { %v164_v2 = vadd.f32 %v163_v0, %v162_v58  ;;  %v323_v12 = vadd.f32 %v322_v3, %v321_v63 }
  0x34   :  { %v165_v4 = vmul.f32 0.010204081, %v164_v2 }
  0x36   :  { %v834_v7 = vsub.f32 %v648_v59, %v165_v4  ;;  %v837_v8 = vsub.f32 %v650_v60, %v165_v4  ;;  %v840_v10 = vsub.f32 %v655_v62, %v165_v4  ;;  %v843_v11 = vsub.f32 %v666_v5, %v165_v4 }
  0x37   :  { %v846_v15 = vsub.f32 %v680_v13, %v165_v4  ;;  %v855_v19 = vsub.f32 %v706_v26, %v165_v4  ;;  %v324_v5 = vrot.slane %v323_v12, 1  ;;  %v860_v20 = vsub.f32 %v723_v35, %v165_v4 }
  0x38   :  { %v179_v18 = vmul.f32 %v834_v7, %v834_v7  ;;  %v180_v59 = vmul.f32 %v837_v8, %v837_v8  ;;  %v181_v60 = vmul.f32 %v840_v10, %v840_v10  ;;  %v182_v62 = vmul.f32 %v843_v11, %v843_v11 }
  0x39   :  { %v183_v13 = vmul.f32 %v846_v15, %v846_v15  ;;  %v868_v26 = vsub.f32 %v739_v45, %v165_v4  ;;  %v184_v31 = vmul.f32 %v855_v19, %v855_v19  ;;  %v874_v35 = vsub.f32 %v753_v54, %v165_v4 }
  0x3a   :  { %v192_v24 = vsel %vm132_vm0, %v179_v18, 0.0  ;;  %v193_v27 = vsel %vm132_vm0, %v180_v59, 0.0  ;;  %v195_v29 = vsel %vm132_vm0, %v181_v60, 0.0  ;;  %v197_v33 = vsel %vm132_vm0, %v182_v62, 0.0 }
  0x3b   :  { %v194_v28 = vadd.f32 %v193_v27, %v192_v24  ;;  %v185_v36 = vmul.f32 %v860_v20, %v860_v20  ;;  %v199_v38 = vsel %vm132_vm0, %v183_v13, 0.0  ;;  %v325_v39 = vadd.f32 %v324_v5, %v323_v12 }
  0x3c   :  { %v880_v41 = vsub.f32 %v767_v1, %v165_v4  ;;  %v186_v45 = vmul.f32 %v868_v26, %v868_v26  ;;  %v201_v44 = vsel %vm132_vm0, %v184_v31, 0.0  ;;  %v888_v54 = vsub.f32 %v778_v9, %v165_v4 }
  0x3d   :  { %v196_v34 = vadd.f32 %v195_v29, %v194_v28  ;;  %v885_v46 = vmul.f32 0.010204081, %v325_v39  ;;  %v187_v47 = vmul.f32 %v874_v35, %v874_v35  ;;  %v203_v49 = vsel %vm132_vm0, %v185_v36, 0.0 }
  0x3e   :  { %v910_v55 = vsub.f32 %v789_v16, %v165_v4  ;;  %v205_v56 = vsel %vm132_vm0, %v186_v45, 0.0  ;;  %v189_v16 = vmul.f32 %v888_v54, %v888_v54 }
  0x3f   :  { %v198_v40 = vadd.f32 %v197_v33, %v196_v34  ;;  %v895_v1 = vsub.f32 %v691_v17, %v885_v46  ;;  %v899_v50 = vsub.f32 %v696_v21, %v885_v46  ;;  %v903_v52 = vsub.f32 %v701_v22, %v885_v46 }
  0x40   :  { %v907_v53 = vsub.f32 %v716_v32, %v885_v46  ;;  %v188_v17 = vmul.f32 %v880_v41, %v880_v41  ;;  %v916_v21 = vsub.f32 %v800_v25, %v165_v4  ;;  %v920_v22 = vsub.f32 %v737_v42, %v885_v46 }
  0x41   :  { %v200_v48 = vadd.f32 %v199_v38, %v198_v40  ;;  %v340_v32 = vmul.f32 %v895_v1, %v895_v1  ;;  %v207_v58 = vsel %vm132_vm0, %v187_v47, 0.0  ;;  %v341_v63 = vmul.f32 %v899_v50, %v899_v50 }
  0x42   :  { %v342_v25 = vmul.f32 %v903_v52, %v903_v52  ;;  %v933_v2 = vsub.f32 %v751_v51, %v885_v46  ;;  %v343_v42 = vmul.f32 %v907_v53, %v907_v53  ;;  %v190_v3 = vmul.f32 %v910_v55, %v910_v55 }
  0x43   :  { %v202_v9 = vadd.f32 %v201_v44, %v200_v48  ;;  %v209_v4 = vsel %vm132_vm0, %v188_v17, 0.0  ;;  %v942_v12 = vsub.f32 %v765_v61, %v885_v46  ;;  %v344_v59 = vmul.f32 %v920_v22, %v920_v22 }
  0x44   :  { %v353_v60 = vsel %vm293_vm1, %v340_v32, 0.0  ;;  %v354_v51 = vsel %vm293_vm1, %v341_v63, 0.0  ;;  %v191_v62 = vmul.f32 %v916_v21, %v916_v21  ;;  %v211_v5 = vsel %vm132_vm0, %v189_v16, 0.0 }
  0x45   :  { %v204_v57 = vadd.f32 %v203_v49, %v202_v9  ;;  %v355_v13 = vadd.f32 %v354_v51, %v353_v60  ;;  %v356_v24 = vsel %vm293_vm1, %v342_v25, 0.0  ;;  %v954_v61 = vsub.f32 %v776_v6, %v885_v46 }
  0x46   :  { %v345_v28 = vmul.f32 %v933_v2, %v933_v2  ;;  %v358_v29 = vsel %vm293_vm1, %v343_v42, 0.0  ;;  %v213_v31 = vsel %vm132_vm0, %v190_v3, 0.0  ;;  %v962_v36 = vsub.f32 %v787_v14, %v885_v46 }
  0x47   :  { %v206_v0 = vadd.f32 %v205_v56, %v204_v57  ;;  %v357_v33 = vadd.f32 %v356_v24, %v355_v13  ;;  %v346_v38 = vmul.f32 %v942_v12, %v942_v12  ;;  %v360_v39 = vsel %vm293_vm1, %v344_v59, 0.0 }
  0x48   :  { %v215_v6 = vsel %vm156_vm2, %v191_v62, 0.0  ;;  %v970_v44 = vsub.f32 %v798_v23, %v885_v46  ;;  %v347_v47 = vmul.f32 %v954_v61, %v954_v61  ;;  %v362_v48 = vsel %vm293_vm1, %v345_v28, 0.0 }
  0x49   :  { %v208_v18 = vadd.f32 %v207_v58, %v206_v0  ;;  %v359_v40 = vadd.f32 %v358_v29, %v357_v33  ;;  %v977_v9 = vsub.f32 %v809_v30, %v885_v46  ;;  %v348_v17 = vmul.f32 %v962_v36, %v962_v36 }
  0x4a   :  { %v364_v56 = vsel %vm293_vm1, %v346_v38, 0.0  ;;  %v984_v23 = vsub.f32 %v818_v37, %v885_v46  ;;  %v349_v16 = vmul.f32 %v970_v44, %v970_v44  ;;  %v366_v58 = vsel %vm293_vm1, %v347_v47, 0.0 }
  0x4b   :  { %v210_v27 = vadd.f32 %v209_v4, %v208_v18  ;;  %v361_v14 = vadd.f32 %v360_v39, %v359_v40  ;;  %v991_v30 = vsub.f32 %v827_v43, %v885_v46  ;;  %v350_v0 = vmul.f32 %v977_v9, %v977_v9 }
  0x4c   :  { %v368_v42 = vsel %vm293_vm1, %v348_v17, 0.0  ;;  %v351_v37 = vmul.f32 %v984_v23, %v984_v23  ;;  %v370_v18 = vsel %vm293_vm1, %v349_v16, 0.0 }
  0x4d   :  { %v212_v34 = vadd.f32 %v211_v5, %v210_v27  ;;  %v363_v57 = vadd.f32 %v362_v48, %v361_v14  ;;  %v352_v51 = vmul.f32 %v991_v30, %v991_v30  ;;  %v372_v43 = vsel %vm293_vm1, %v350_v0, 0.0  ;;  %v224_v14 = vld [vmem:[%s1148_s2] sm:$0x1] }
  0x4e   :  { %v374_v5 = vsel %vm293_vm1, %v351_v37, 0.0 }
  0x4f   :  { %v214_v45 = vadd.f32 %v213_v31, %v212_v34  ;;  %v365_v63 = vadd.f32 %v364_v56, %v363_v57  ;;  %v376_v27 = vsel %vm317_vm3, %v352_v51, 0.0 }
  0x51   :  { %v216_v49 = vadd.f32 %v215_v6, %v214_v45  ;;  %v367_v3 = vadd.f32 %v366_v58, %v365_v63  ;;  %v229_v6 = vlaneseq  ;;  %v488_v58 = vld [vmem:[%s1149_s3] ss:$0 sm:$0xff] }
  0x53   :  { %v217_v32 = vrot.slane %v216_v49, 4  ;;  %v369_v59 = vadd.f32 %v368_v42, %v367_v3  ;;  %v230_v47 = vshrl.u32 %v229_v6, 7 }
  0x55   :  { %v218_v25 = vadd.f32 %v217_v32, %v216_v49  ;;  %v371_v46 = vadd.f32 %v370_v18, %v369_v59  ;;  %v231_v17 = vsub.s32 0, %v230_v47 }
  0x57   :  { %v219_v4 = vrot.slane %v218_v25, 2  ;;  %v373_v13 = vadd.f32 %v372_v43, %v371_v46 }
  0x59   :  { %v220_v60 = vadd.f32 %v219_v4, %v218_v25  ;;  %v375_v28 = vadd.f32 %v374_v5, %v373_v13 }
  0x5b   :  { %v221_v62 = vrot.slane %v220_v60, 1  ;;  %v377_v31 = vadd.f32 %v376_v27, %v375_v28  ;;  %v489_v27 = vld [vmem:[%s1152_s5] ss:$0 sm:$0xff] }
  0x5d   :  { %v222_v24 = vadd.f32 %v221_v62, %v220_v60  ;;  %v378_v34 = vrot.slane %v377_v31, 4 }
  0x5f   :  { %v223_v29 = vmul.f32 0.010204081, %v222_v24  ;;  %v379_v38 = vadd.f32 %v378_v34, %v377_v31 }
  0x61   :  { %v225_v33 = vadd.f32 1e-05, %v223_v29  ;;  %v380_v39 = vrot.slane %v379_v38, 2 }
  0x63   :  { %490 = vrsqrt.f32 %v225_v33  ;;  %v381_v40 = vadd.f32 %v380_v39, %v379_v38 }
  0x65   :  { %v382_v45 = vrot.slane %v381_v40, 1 }
  0x67   :  { %v383_v48 = vadd.f32 %v382_v45, %v381_v40 }
  0x69   :  { %v384_v49 = vmul.f32 0.010204081, %v383_v48 }
  0x6b   :  { %v386_v57 = vadd.f32 1e-05, %v384_v49 }
  0x6d   :  { %492 = vrsqrt.f32 %v386_v57 }
  0x70   :  { %v491_v56 = vpop.eup %490 }
  0x71   :  { %v227_v32 = vmul.f32 %v491_v56, %v224_v14 }
  0x73   :  { %v232_v16 = vrot.slane %v227_v32, %v231_v17 }
  0x75   :  { %v234_v63 = vmul.f32 %v232_v16, %v834_v7  ;;  %v235_v25 = vmul.f32 %v232_v16, %v837_v8  ;;  %v236_v0 = vmul.f32 %v232_v16, %v840_v10  ;;  %v237_v42 = vmul.f32 %v232_v16, %v843_v11 }
  0x76   :  { %v238_v3 = vmul.f32 %v232_v16, %v846_v15  ;;  %v239_v4 = vmul.f32 %v232_v16, %v855_v19  ;;  %v240_v37 = vmul.f32 %v232_v16, %v860_v20  ;;  %v241_v18 = vmul.f32 %v232_v16, %v868_v26 }
  0x77   :  { %v254_v59 = vadd.f32 %v488_v58, %v234_v63  ;;  %v255_v60 = vadd.f32 %v488_v58, %v235_v25  ;;  %v256_v51 = vadd.f32 %v488_v58, %v236_v0  ;;  %v257_v43 = vadd.f32 %v488_v58, %v237_v42 }
  0x78   :  { %v258_v46 = vadd.f32 %v488_v58, %v238_v3  ;;  %v259_v7 = vadd.f32 %v488_v58, %v239_v4  ;;  %v260_v62 = vadd.f32 %v488_v58, %v240_v37  ;;  %v261_v8 = vadd.f32 %v488_v58, %v241_v18 }
  0x79   :  { %267 = vst.msk [vmem:[%s1150_s6] sm:$0xff] %vm132_vm0, %v254_v59  ;;  %268 = vst.msk [vmem:[%s1150_s6 + $0x8] sm:$0xff] %vm132_vm0, %v255_v60  ;;  %v242_v10 = vmul.f32 %v232_v16, %v874_v35  ;;  %v243_v11 = vmul.f32 %v232_v16, %v880_v41  ;;  %v244_v15 = vmul.f32 %v232_v16, %v888_v54 }
  0x7a   :  { %269 = vst.msk [vmem:[%s1150_s6 + $0x10] sm:$0xff] %vm132_vm0, %v256_v51  ;;  %270 = vst.msk [vmem:[%s1150_s6 + $0x18] sm:$0xff] %vm132_vm0, %v257_v43  ;;  %v245_v19 = vmul.f32 %v232_v16, %v910_v55  ;;  %v246_v20 = vmul.f32 %v232_v16, %v916_v21  ;;  %v385_v21 = vld [vmem:[%s1151_s4] sm:$0x1]  ;;  %v493_v5 = vpop.eup %492 }
  0x7b   :  { %271 = vst.msk [vmem:[%s1150_s6 + $0x20] sm:$0xff] %vm132_vm0, %v258_v46  ;;  %272 = vst.msk [vmem:[%s1150_s6 + $0x28] sm:$0xff] %vm132_vm0, %v259_v7  ;;  %v262_v26 = vadd.f32 %v488_v58, %v242_v10  ;;  %v263_v35 = vadd.f32 %v488_v58, %v243_v11  ;;  %v264_v41 = vadd.f32 %v488_v58, %v244_v15 }
  0x7c   :  { %273 = vst.msk [vmem:[%s1150_s6 + $0x30] sm:$0xff] %vm132_vm0, %v260_v62  ;;  %274 = vst.msk [vmem:[%s1150_s6 + $0x38] sm:$0xff] %vm132_vm0, %v261_v8  ;;  %v265_v54 = vadd.f32 %v488_v58, %v245_v19  ;;  %v266_v55 = vadd.f32 %v488_v58, %v246_v20  ;;  %v388_v13 = vmul.f32 %v493_v5, %v385_v21 }
  0x7d   :  { %275 = vst.msk [vmem:[%s1150_s6 + $0x40] sm:$0xff] %vm132_vm0, %v262_v26  ;;  %276 = vst.msk [vmem:[%s1150_s6 + $0x48] sm:$0xff] %vm132_vm0, %v263_v35 }
  0x7e   :  { %277 = vst.msk [vmem:[%s1150_s6 + $0x50] sm:$0xff] %vm132_vm0, %v264_v41  ;;  %278 = vst.msk [vmem:[%s1150_s6 + $0x58] sm:$0xff] %vm132_vm0, %v265_v54  ;;  %v393_v24 = vrot.slane %v388_v13, %v231_v17 }
  0x7f   :  { %279 = vst.msk [vmem:[%s1150_s6 + $0x60] sm:$0x3] %vm156_vm2, %v266_v55 }
  0x80   :  { %v395_v28 = vmul.f32 %v393_v24, %v895_v1  ;;  %v396_v29 = vmul.f32 %v393_v24, %v899_v50  ;;  %v397_v31 = vmul.f32 %v393_v24, %v903_v52  ;;  %v398_v33 = vmul.f32 %v393_v24, %v907_v53 }
  0x81   :  { %v399_v34 = vmul.f32 %v393_v24, %v920_v22  ;;  %v400_v38 = vmul.f32 %v393_v24, %v933_v2  ;;  %v401_v39 = vmul.f32 %v393_v24, %v942_v12  ;;  %v402_v6 = vmul.f32 %v393_v24, %v954_v61 }
  0x82   :  { %v415_v40 = vadd.f32 %v489_v27, %v395_v28  ;;  %v416_v45 = vadd.f32 %v489_v27, %v396_v29  ;;  %v417_v47 = vadd.f32 %v489_v27, %v397_v31  ;;  %v418_v48 = vadd.f32 %v489_v27, %v398_v33 }
  0x83   :  { %v419_v14 = vadd.f32 %v489_v27, %v399_v34  ;;  %v420_v1 = vadd.f32 %v489_v27, %v400_v38  ;;  %v421_v49 = vadd.f32 %v489_v27, %v401_v39  ;;  %v422_v50 = vadd.f32 %v489_v27, %v402_v6 }
  0x84   :  { %428 = vst.msk [vmem:[%s1153_s7] sm:$0xff] %vm293_vm1, %v415_v40  ;;  %429 = vst.msk [vmem:[%s1153_s7 + $0x8] sm:$0xff] %vm293_vm1, %v416_v45  ;;  %v403_v52 = vmul.f32 %v393_v24, %v962_v36  ;;  %v404_v53 = vmul.f32 %v393_v24, %v970_v44  ;;  %v405_v22 = vmul.f32 %v393_v24, %v977_v9 }
  0x85   :  { %430 = vst.msk [vmem:[%s1153_s7 + $0x10] sm:$0xff] %vm293_vm1, %v417_v47  ;;  %431 = vst.msk [vmem:[%s1153_s7 + $0x18] sm:$0xff] %vm293_vm1, %v418_v48  ;;  %v406_v2 = vmul.f32 %v393_v24, %v984_v23  ;;  %v407_v12 = vmul.f32 %v393_v24, %v991_v30 }
  0x86   :  { %432 = vst.msk [vmem:[%s1153_s7 + $0x20] sm:$0xff] %vm293_vm1, %v419_v14  ;;  %433 = vst.msk [vmem:[%s1153_s7 + $0x28] sm:$0xff] %vm293_vm1, %v420_v1  ;;  %v423_v61 = vadd.f32 %v489_v27, %v403_v52  ;;  %v424_v36 = vadd.f32 %v489_v27, %v404_v53  ;;  %v425_v44 = vadd.f32 %v489_v27, %v405_v22 }
  0x87   :  { %434 = vst.msk [vmem:[%s1153_s7 + $0x30] sm:$0xff] %vm293_vm1, %v421_v49  ;;  %435 = vst.msk [vmem:[%s1153_s7 + $0x38] sm:$0xff] %vm293_vm1, %v422_v50  ;;  %v426_v9 = vadd.f32 %v489_v27, %v406_v2  ;;  %v427_v23 = vadd.f32 %v489_v27, %v407_v12 }
  0x88   :  { %436 = vst.msk [vmem:[%s1153_s7 + $0x40] sm:$0xff] %vm293_vm1, %v423_v61  ;;  %437 = vst.msk [vmem:[%s1153_s7 + $0x48] sm:$0xff] %vm293_vm1, %v424_v36 }
  0x89   :  { %438 = vst.msk [vmem:[%s1153_s7 + $0x50] sm:$0xff] %vm293_vm1, %v425_v44  ;;  %439 = vst.msk [vmem:[%s1153_s7 + $0x58] sm:$0xff] %vm293_vm1, %v426_v9 }
  0x8a   :  { %440 = vst.msk [vmem:[%s1153_s7 + $0x60] sm:$0x3] %vm317_vm3, %v427_v23 }

</bundles_post_ra>
